<compile_context>
chip_gen: v7x
topology: tpu7x:2x2x1
jax: 0.10.0
libtpu: 0.0.40
codegen_flags: <defaults>
</compile_context>

<pallas_src>
import jax
import jax.numpy as jnp
from jax.experimental import pallas as pl
from jax.experimental.pallas import tpu as pltpu

_PACK = 8  # batch rows packed per sublane row (sublane count)


def _round_up(n, m):
    return ((n + m - 1) // m) * m


def _default_bf16_epilogue():
    """bf16 VALU exists on v6e/v7x; keep f32 epilogue on v5e/older/unknown."""
    try:
        kind = jax.devices()[0].device_kind.lower()
    except Exception:
        return False
    return ("v6" in kind) or ("v7" in kind)


def _expand_weight(w, p=_PACK):
    """PyTorch-style W (out, in) -> block-diagonal (p*in, p*out) so that the packed
    activation (rows = p batch elements each) can use a plain GEMM:
        We[s*in + i, s*out + o] = W[o, i]."""
    o_dim, i_dim = w.shape
    eye = jnp.eye(p, dtype=w.dtype)
    we = jnp.einsum("st,oi->sito", eye, w)           # (p, in, p, out)
    return we.reshape(p * i_dim, p * o_dim)


def _expand_bias(b, p=_PACK):
    """b (out, 1) or (out,) -> (1, p*out) with be[0, s*out + o] = b[o]."""
    bf = b.reshape(-1)
    return jnp.tile(bf, (p,)).reshape(1, -1)


def _make_kernel(ep_dtype):
    def encoder_kernel(x_ref, w1_ref, b1_ref, w2_ref, b2_ref, wz_ref, bz_ref, o_ref):
        # x_ref : (tile_r, 8*in)  f32   -- 8 batch rows packed per sublane row (lane-dense)
        # w*_ref: (8*in, 8*out)   bf16  -- block-diagonal expanded weights, VMEM-resident
        # b*_ref: (1, 8*out)            -- packed bias, broadcast along sublanes
        # o_ref : (tile_r, 8*z)   f32   -- packed latent; reshapes to (B, z_dim) for free
        h = x_ref[...].astype(jnp.bfloat16)               # lane-dense f32->bf16 cast
        for w_ref, b_ref in ((w1_ref, b1_ref), (w2_ref, b2_ref)):
            # Linear (MXU, f32 accumulate) + bias + ReLU (Dropout == identity, eval mode)
            acc = jnp.dot(h, w_ref[...], preferred_element_type=jnp.float32)
            a = acc.astype(ep_dtype) + b_ref[...]         # epilogue in bf16 on v6e/v7x
            h = jnp.maximum(a, 0.0).astype(jnp.bfloat16)
        acc = jnp.dot(h, wz_ref[...], preferred_element_type=jnp.float32)
        o_ref[...] = acc + bz_ref[...]                    # latent projection, f32 out
    return encoder_kernel


def encoder_forward(x, params, *, tile_r=None, bf16_epilogue=None):
    """x: (B, input_size) f32.  params: PyTorch-style (out,in) weights, (out,1) biases.
    Returns (B, z_dim) f32, matching Encoder.forward semantics (eval mode)."""
    B, in_dim = x.shape
    z_dim = params["wz"].shape[0]
    p = _PACK

    if bf16_epilogue is None:
        bf16_epilogue = _default_bf16_epilogue()
    ep_dtype = jnp.bfloat16 if bf16_epilogue else jnp.float32

    # Pack 8 batch rows per sublane row.  For B % 8 == 0 this is a pure
    # layout-preserving reshape (free under jit); otherwise pad the few missing rows.
    b_pad = _round_up(B, p)
    if b_pad != B:
        x = jnp.pad(x, ((0, b_pad - B), (0, 0)))   # rare path; pad batches upstream to avoid it
    r_total = b_pad // p
    xp = x.reshape(r_total, p * in_dim)

    # Tiny one-time parameter repack (negligible; hoist out of the step if desired).
    w1e = _expand_weight(params["w1"], p).astype(jnp.bfloat16)
    w2e = _expand_weight(params["w2"], p).astype(jnp.bfloat16)
    wze = _expand_weight(params["wz"], p).astype(jnp.bfloat16)
    b1e = _expand_bias(params["b1"], p).astype(ep_dtype)
    b2e = _expand_bias(params["b2"], p).astype(ep_dtype)
    bze = _expand_bias(params["bz"], p).astype(jnp.float32)

    if tile_r is None:
        # ~8192 batch rows per grid step (amortizes ~0.35us/step overhead, >=256 KiB DMAs),
        # but keep >= 2 grid steps when possible so "parallel" can shard across v7x's 2 TCs.
        # On v5e, sweep down to 512 if the lone vst slot saturates on f32 intermediate spills.
        tile_r = max(8, min(1024, _round_up(pl.cdiv(r_total, 2), 8)))
    tile_r = int(min(tile_r, _round_up(r_total, 8)))   # multiple of 8 -> legal block shape

    grid = (pl.cdiv(r_total, tile_r),)                 # partial last block handled by Pallas

    def resident(a):
        # Constant index_map => block stays VMEM-resident across all grid steps;
        # Pallas does not re-issue its DMA.
        return pl.BlockSpec(a.shape, lambda i: (0, 0))

    zp = pl.pallas_call(
        _make_kernel(ep_dtype),
        out_shape=jax.ShapeDtypeStruct((r_total, p * z_dim), jnp.float32),
        grid=grid,
        in_specs=[
            pl.BlockSpec((tile_r, p * in_dim), lambda i: (i, 0)),   # streamed packed-x tile
            resident(w1e), resident(b1e),
            resident(w2e), resident(b2e),
            resident(wze), resident(bze),
        ],
        out_specs=pl.BlockSpec((tile_r, p * z_dim), lambda i: (i, 0)),
        compiler_params=pltpu.CompilerParams(
            dimension_semantics=("parallel",)),   # batch axis: pipelined + megacore-splittable
    )(xp, w1e, b1e, w2e, b2e, wze, bze)

    # Packed latent (B/8, 8*z) -> (B, z_dim): layout-preserving reshape, no transpose pass.
    z = zp.reshape(b_pad, z_dim)
    return z if b_pad == B else z[:B]


def init_params(key, input_size, hidden_sizes, z_dim):
    """Deterministic init matching nn.Linear: W (out, in), b (out, 1), U(-1/sqrt(fan_in), ...)."""
    dims = [input_size, *hidden_sizes, z_dim]
    names = [str(i) for i in range(1, len(dims) - 1)] + ["z"]
    params = {}
    keys = jax.random.split(key, 2 * len(names))
    for n, name in enumerate(names):
        fan_in, fan_out = dims[n], dims[n + 1]
        bound = 1.0 / jnp.sqrt(fan_in)
        params[f"w{name}"] = jax.random.uniform(
            keys[2 * n], (fan_out, fan_in), jnp.float32, -bound, bound)
        params[f"b{name}"] = jax.random.uniform(
            keys[2 * n + 1], (fan_out, 1), jnp.float32, -bound, bound)
    return params


def encoder_ref(x, params, *, bf16_epilogue=False):
    """Pure-JAX reference mirroring the kernel math (bf16 operands, f32 accumulate,
    epilogue in the same dtype as the kernel)."""
    ep = jnp.bfloat16 if bf16_epilogue else jnp.float32

    def layer(h, w, b, act=True):
        acc = jnp.dot(h.astype(jnp.bfloat16), w.astype(jnp.bfloat16).T,
                      preferred_element_type=jnp.float32)
        if not act:
            return acc + b.reshape(1, -1)
        a = acc.astype(ep) + b.reshape(1, -1).astype(ep)
        return jnp.maximum(a, 0.0)

    h = layer(x, params["w1"], params["b1"])
    h = layer(h, params["w2"], params["b2"])
    return layer(h, params["wz"], params["bz"], act=False)


if __name__ == "__main__":
    key = jax.random.PRNGKey(0)
    k_x, k_p = jax.random.split(key)

    batch = 200          # 25 packed rows -> 2 grid steps with a partial final block
    input_size = 16      # n_timesteps
    hidden_sizes = [32, 32]
    z_dim = 8
    dropout = 0.1        # nn.Dropout is identity in eval mode

    x = jax.random.normal(k_x, (batch, input_size), dtype=jnp.float32)
    params = init_params(k_p, input_size, hidden_sizes, z_dim)

    bf16_ep = _default_bf16_epilogue()
    fwd = jax.jit(lambda xx, pp: encoder_forward(xx, pp, bf16_epilogue=bf16_ep))
    out = jax.block_until_ready(fwd(x, params))

    ref = encoder_ref(x, params, bf16_epilogue=bf16_ep)
    assert out.shape == (batch, z_dim)
    max_err = float(jnp.max(jnp.abs(out - ref)))
    assert jnp.allclose(out, ref, atol=1e-2, rtol=1e-2), max_err

    print("KERNEL_OK")
</pallas_src>

<mosaic_0001>
module attributes {stable_mosaic.version = 11 : i64} {
  func.func @encoder_kernel(%arg0: i32, %arg1: memref<16x128xf32, #tpu.memory_space<vmem>>, %arg2: memref<128x256xbf16, #tpu.memory_space<vmem>>, %arg3: memref<1x256xf32, #tpu.memory_space<vmem>>, %arg4: memref<256x256xbf16, #tpu.memory_space<vmem>>, %arg5: memref<1x256xf32, #tpu.memory_space<vmem>>, %arg6: memref<256x64xbf16, #tpu.memory_space<vmem>>, %arg7: memref<1x64xf32, #tpu.memory_space<vmem>>, %arg8: memref<16x64xf32, #tpu.memory_space<vmem>>) attributes {dimension_semantics = [#tpu.dimension_semantics<parallel>], iteration_bounds = array<i64: 2>, scalar_prefetch = 0 : i64, scratch_operands = 0 : i64, tpu.core_type = #tpu.core_type<tc>, window_params = [{transform_indices = @transform_0, window_bounds = array<i64: 16, 128>}, {pipeline_mode = #tpu.pipeline_mode<synchronous>, transform_indices = @transform_1, window_bounds = array<i64: 128, 256>}, {pipeline_mode = #tpu.pipeline_mode<synchronous>, transform_indices = @transform_2, window_bounds = array<i64: 1, 256>}, {pipeline_mode = #tpu.pipeline_mode<synchronous>, transform_indices = @transform_3, window_bounds = array<i64: 256, 256>}, {pipeline_mode = #tpu.pipeline_mode<synchronous>, transform_indices = @transform_4, window_bounds = array<i64: 1, 256>}, {pipeline_mode = #tpu.pipeline_mode<synchronous>, transform_indices = @transform_5, window_bounds = array<i64: 256, 64>}, {pipeline_mode = #tpu.pipeline_mode<synchronous>, transform_indices = @transform_6, window_bounds = array<i64: 1, 64>}, {transform_indices = @transform_7, window_bounds = array<i64: 16, 64>}]} {
    %c0 = arith.constant 0 : index
    %c0_0 = arith.constant 0 : index
    %0 = vector.load %arg1[%c0, %c0_0] : memref<16x128xf32, #tpu.memory_space<vmem>>, vector<16x128xf32>
    %1 = arith.truncf %0 : vector<16x128xf32> to vector<16x128xbf16>
    %c0_1 = arith.constant 0 : index
    %c0_2 = arith.constant 0 : index
    %2 = vector.load %arg2[%c0_1, %c0_2] : memref<128x256xbf16, #tpu.memory_space<vmem>>, vector<128x256xbf16>
    %cst = arith.constant dense<0.000000e+00> : vector<16x256xf32>
    %3 = tpu.matmul %1, %2, %cst {dimension_numbers = #tpu.dot_dimension_numbers<[1], [0], [0], [1], [0, 0, 1, 1], [], []>} : vector<16x128xbf16>, vector<128x256xbf16>, vector<16x256xf32> -> vector<16x256xf32>
    %c0_3 = arith.constant 0 : index
    %c0_4 = arith.constant 0 : index
    %4 = vector.load %arg3[%c0_3, %c0_4] : memref<1x256xf32, #tpu.memory_space<vmem>>, vector<1x256xf32>
    %5 = vector.broadcast %4 : vector<1x256xf32> to vector<16x256xf32>
    %6 = arith.addf %3, %5 : vector<16x256xf32>
    %cst_5 = arith.constant 0.000000e+00 : f32
    %7 = vector.broadcast %cst_5 : f32 to vector<16x256xf32>
    %8 = arith.maximumf %6, %7 : vector<16x256xf32>
    %9 = arith.truncf %8 : vector<16x256xf32> to vector<16x256xbf16>
    %c0_6 = arith.constant 0 : index
    %c0_7 = arith.constant 0 : index
    %10 = vector.load %arg4[%c0_6, %c0_7] : memref<256x256xbf16, #tpu.memory_space<vmem>>, vector<256x256xbf16>
    %cst_8 = arith.constant dense<0.000000e+00> : vector<16x256xf32>
    %11 = tpu.matmul %9, %10, %cst_8 {dimension_numbers = #tpu.dot_dimension_numbers<[1], [0], [0], [1], [0, 0, 1, 1], [], []>} : vector<16x256xbf16>, vector<256x256xbf16>, vector<16x256xf32> -> vector<16x256xf32>
    %c0_9 = arith.constant 0 : index
    %c0_10 = arith.constant 0 : index
    %12 = vector.load %arg5[%c0_9, %c0_10] : memref<1x256xf32, #tpu.memory_space<vmem>>, vector<1x256xf32>
    %13 = vector.broadcast %12 : vector<1x256xf32> to vector<16x256xf32>
    %14 = arith.addf %11, %13 : vector<16x256xf32>
    %cst_11 = arith.constant 0.000000e+00 : f32
    %15 = vector.broadcast %cst_11 : f32 to vector<16x256xf32>
    %16 = arith.maximumf %14, %15 : vector<16x256xf32>
    %17 = arith.truncf %16 : vector<16x256xf32> to vector<16x256xbf16>
    %c0_12 = arith.constant 0 : index
    %c0_13 = arith.constant 0 : index
    %18 = vector.load %arg6[%c0_12, %c0_13] : memref<256x64xbf16, #tpu.memory_space<vmem>>, vector<256x64xbf16>
    %cst_14 = arith.constant dense<0.000000e+00> : vector<16x64xf32>
    %19 = tpu.matmul %17, %18, %cst_14 {dimension_numbers = #tpu.dot_dimension_numbers<[1], [0], [0], [1], [0, 0, 1, 1], [], []>} : vector<16x256xbf16>, vector<256x64xbf16>, vector<16x64xf32> -> vector<16x64xf32>
    %c0_15 = arith.constant 0 : index
    %c0_16 = arith.constant 0 : index
    %20 = vector.load %arg7[%c0_15, %c0_16] : memref<1x64xf32, #tpu.memory_space<vmem>>, vector<1x64xf32>
    %21 = vector.broadcast %20 : vector<1x64xf32> to vector<16x64xf32>
    %22 = arith.addf %19, %21 : vector<16x64xf32>
    %c0_17 = arith.constant 0 : index
    %c0_18 = arith.constant 0 : index
    %23 = vector.load %arg8[%c0_17, %c0_18] : memref<16x64xf32, #tpu.memory_space<vmem>>, vector<16x64xf32>
    tpu.vector_store %arg8[%c0_17, %c0_18], %22 {strides = array<i32>} : memref<16x64xf32, #tpu.memory_space<vmem>>, vector<16x64xf32>,
    return
  }
  func.func @transform_0(%arg0: i32) -> (i32, i32) {
    %c0_i32 = arith.constant 0 : i32
    %c0_i32_0 = arith.constant 0 : i32
    return %arg0, %c0_i32 : i32, i32
  }
  func.func @transform_1(%arg0: i32) -> (i32, i32) {
    %c0_i32 = arith.constant 0 : i32
    %c0_i32_0 = arith.constant 0 : i32
    %c0_i32_1 = arith.constant 0 : i32
    return %c0_i32, %c0_i32_0 : i32, i32
  }
  func.func @transform_2(%arg0: i32) -> (i32, i32) {
    %c0_i32 = arith.constant 0 : i32
    %c0_i32_0 = arith.constant 0 : i32
    %c0_i32_1 = arith.constant 0 : i32
    return %c0_i32, %c0_i32_0 : i32, i32
  }
  func.func @transform_3(%arg0: i32) -> (i32, i32) {
    %c0_i32 = arith.constant 0 : i32
    %c0_i32_0 = arith.constant 0 : i32
    %c0_i32_1 = arith.constant 0 : i32
    return %c0_i32, %c0_i32_0 : i32, i32
  }
  func.func @transform_4(%arg0: i32) -> (i32, i32) {
    %c0_i32 = arith.constant 0 : i32
    %c0_i32_0 = arith.constant 0 : i32
    %c0_i32_1 = arith.constant 0 : i32
    return %c0_i32, %c0_i32_0 : i32, i32
  }
  func.func @transform_5(%arg0: i32) -> (i32, i32) {
    %c0_i32 = arith.constant 0 : i32
    %c0_i32_0 = arith.constant 0 : i32
    %c0_i32_1 = arith.constant 0 : i32
    return %c0_i32, %c0_i32_0 : i32, i32
  }
  func.func @transform_6(%arg0: i32) -> (i32, i32) {
    %c0_i32 = arith.constant 0 : i32
    %c0_i32_0 = arith.constant 0 : i32
    %c0_i32_1 = arith.constant 0 : i32
    return %c0_i32, %c0_i32_0 : i32, i32
  }
  func.func @transform_7(%arg0: i32) -> (i32, i32) {
    %c0_i32 = arith.constant 0 : i32
    %c0_i32_0 = arith.constant 0 : i32
    return %arg0, %c0_i32 : i32, i32
  }
}

</mosaic_0001>

<bundles_post_ra>
// kernel: tile.14
= control target key start
LH: loop header
LB: loop body
LE: loop exit
PB: predicated region body
PF: predicated region fallthrough
CT: control target
= control target key end

     0   :  { %s22_s0 = inlined_call_operand.vmem [shape: f32[32], index: 0, kind: input, shape index: {}]   ;;  %s23_s1 = inlined_call_operand.vmem [shape: f32[8,32], index: 1, kind: output, shape index: {}]  }
   0x1   :  { %v4_v0 = vld [vmem:[%s22_s0] ss:$0 sm:$0xff] }
   0x2   :  { %5 = vst [vmem:[%s23_s1] sm:$0xff] %v4_v0 }

// kernel: tile.15
= control target key start
LH: loop header
LB: loop body
LE: loop exit
PB: predicated region body
PF: predicated region fallthrough
CT: control target
= control target key end

     0   :  { %s7_s6 = smov 3  ;;  %s14_s9 = smov 3  ;;  %vm4_vm0 = vcmask 261120   ;;  %vm11_vm1 = vcmask 1048320   ;;  %vm18_vm2 = vcmask 785920   ;;  %vm25_vm3 = vcmask 523520   ;;  %s76_s0 = inlined_call_operand.vmem [shape: f32[8,32], index: 0, kind: input, shape index: {}]   ;;  %s77_s1 = inlined_call_operand.vmem [shape: f32[1,256], index: 1, kind: output, shape index: {}]  }
   0x1   :  { %v38_v0 = vld [vmem:[%s76_s0 + $0x3] ss:$4 sm:%s7_s6]   ;;  %s45_s10 = smov 96   ;;  %s21_s11 = smov 3  ;;  %v39_v1 = vld [vmem:[%s76_s0 + $0x2] ss:$4 sm:%s14_s9]  }
   0x2   :  { %9 = vrot.lane.b32.xlu0 %v38_v0, %s45_s10  ;;  %v40_v2 = vld [vmem:[%s76_s0 + $0x1] ss:$4 sm:%s21_s11]   ;;  %s2_s16 = smov 3  ;;  %s46_s17 = smov 32  }
   0x3   :  { %23 = vrot.lane.b32.xlu1 %v40_v2, %s46_s17  ;;  %v3_v3 = vld [vmem:[%s76_s0] ss:$4 sm:%s2_s16]   ;;  %s47_s0 = smov 64  }
   0x4   :  { %5 = vst.msk [vmem:[#allocation0] ss:$8 sm:$0x3] %vm4_vm0, %v3_v3  }
   0x6   :  { %16 = vrot.lane.b32.xlu0 %v39_v1, %s47_s0 }
  0x74   :  { %v10_v4 = vpop.permute.xlu0 %9  }
  0x75   :  { %12 = vst.msk [vmem:[#allocation0] ss:$8 sm:$0x3] %vm11_vm1, %v10_v4   ;;  %v24_v5 = vpop.permute.xlu1 %23  }
  0x78   :  { %v17_v6 = vpop.permute.xlu0 %16  }
  0x79   :  { %19 = vst.msk [vmem:[#allocation0] ss:$8 sm:$0x3] %vm18_vm2, %v17_v6  }
  0x7a   :  { %26 = vst.msk [vmem:[#allocation0] ss:$8 sm:$0x3] %vm25_vm3, %v24_v5  }
  0x81   :  { %v30_v7 = vld [vmem:[#allocation0] sm:$0x1]  ;;  %v34_v8 = vld [vmem:[#allocation0 + $0x8] sm:$0x1] }
  0x82   :  { %32 = vst [vmem:[%s77_s1] sm:$0x1] %v30_v7  ;;  %41 = vst [vmem:[%s77_s1 + $0x1] sm:$0x1] %v34_v8 }

// kernel: tile.22
= control target key start
LH: loop header
LB: loop body
LE: loop exit
PB: predicated region body
PF: predicated region fallthrough
CT: control target
= control target key end

     0   :  { %s22_s0 = inlined_call_operand.vmem [shape: f32[8], index: 0, kind: input, shape index: {}]   ;;  %s23_s1 = inlined_call_operand.vmem [shape: f32[8,8], index: 1, kind: output, shape index: {}]  }
   0x1   :  { %v4_v0 = vld [vmem:[%s22_s0] ss:$0 sm:$0xff] }
   0x2   :  { %5 = vst [vmem:[%s23_s1] sm:$0xff] %v4_v0 }

// kernel: tile.23
= control target key start
LH: loop header
LB: loop body
LE: loop exit
PB: predicated region body
PF: predicated region fallthrough
CT: control target
= control target key end

     0   :  { %s67_s10 = smov 56   ;;  %s68_s11 = smov 40   ;;  %vm3_vm0 = vcmask 64512   ;;  %vm9_vm1 = vcmask 523712   ;;  %vm15_vm2 = vcmask 458112   ;;  %vm21_vm3 = vcmask 392512   ;;  %s111_s0 = inlined_call_operand.vmem [shape: f32[8,8], index: 0, kind: input, shape index: {}]   ;;  %s112_s1 = inlined_call_operand.vmem [shape: f32[1,64], index: 1, kind: output, shape index: {}]  }
   0x1   :  { %v53_v0 = vld [vmem:[%s111_s0 + $0x7] sm:$0x1]   ;;  %v55_v1 = vld [vmem:[%s111_s0 + $0x5] sm:$0x1]   ;;  %v54_v2 = vld [vmem:[%s111_s0 + $0x6] sm:$0x1]  }
   0x2   :  { %7 = vrot.lane.b32.xlu0 %v53_v0, %s67_s10  ;;  %19 = vrot.lane.b32.xlu1 %v55_v1, %s68_s11  ;;  %v56_v3 = vld [vmem:[%s111_s0 + $0x4] sm:$0x1]   ;;  %v2_v4 = vld [vmem:[%s111_s0] sm:$0x1]   ;;  %s69_s18 = smov 48   ;;  %s70_s19 = smov 32  }
   0x3   :  { %4 = vst.msk [vmem:[#allocation0] sm:$0x1] %vm3_vm0, %v2_v4   ;;  %v57_v5 = vld [vmem:[%s111_s0 + $0x3] sm:$0x1]   ;;  %v58_v6 = vld [vmem:[%s111_s0 + $0x2] sm:$0x1]  }
   0x4   :  { %s71_s24 = smov 24   ;;  %s72_s25 = smov 16   ;;  %v59_v7 = vld [vmem:[%s111_s0 + $0x1] sm:$0x1]   ;;  %vm27_vm4 = vcmask 326912   ;;  %vm33_vm5 = vcmask 261312  }
   0x5   :  { %s73_s0 = smov 8   ;;  %vm39_vm6 = vcmask 195712   ;;  %vm45_vm7 = vcmask 130112  }
   0x6   :  { %13 = vrot.lane.b32.xlu0 %v54_v2, %s69_s18  ;;  %25 = vrot.lane.b32.xlu1 %v56_v3, %s70_s19 }
   0xa   :  { %31 = vrot.lane.b32.xlu0 %v57_v5, %s71_s24  ;;  %37 = vrot.lane.b32.xlu1 %v58_v6, %s72_s25 }
   0xe   :  { %43 = vrot.lane.b32.xlu0 %v59_v7, %s73_s0 }
  0x74   :  { %v8_v8 = vpop.permute.xlu0 %7   ;;  %v20_v9 = vpop.permute.xlu1 %19  }
  0x75   :  { %10 = vst.msk [vmem:[#allocation0] sm:$0x1] %vm9_vm1, %v8_v8  }
  0x78   :  { %v14_v10 = vpop.permute.xlu0 %13   ;;  %v26_v11 = vpop.permute.xlu1 %25  }
  0x79   :  { %16 = vst.msk [vmem:[#allocation0] sm:$0x1] %vm15_vm2, %v14_v10  }
  0x7a   :  { %22 = vst.msk [vmem:[#allocation0] sm:$0x1] %vm21_vm3, %v20_v9  }
  0x7b   :  { %28 = vst.msk [vmem:[#allocation0] sm:$0x1] %vm27_vm4, %v26_v11  }
  0x7c   :  { %v32_v12 = vpop.permute.xlu0 %31   ;;  %v38_v13 = vpop.permute.xlu1 %37  }
  0x7d   :  { %34 = vst.msk [vmem:[#allocation0] sm:$0x1] %vm33_vm5, %v32_v12  }
  0x7e   :  { %40 = vst.msk [vmem:[#allocation0] sm:$0x1] %vm39_vm6, %v38_v13  }
  0x80   :  { %v44_v14 = vpop.permute.xlu0 %43  }
  0x81   :  { %46 = vst.msk [vmem:[#allocation0] sm:$0x1] %vm45_vm7, %v44_v14  }
  0x88   :  { %v50_v15 = vld [vmem:[#allocation0] sm:$0x1] }
  0x89   :  { %52 = vst [vmem:[%s112_s1] sm:$0x1] %v50_v15 }

// kernel: _lambda_.1
= control target key start
LH: loop header
LB: loop body
LE: loop exit
PB: predicated region body
PF: predicated region fallthrough
CT: control target
= control target key end

     0   :  { %s1175_s24 = smov 0   ;;  %s1400_s0 = inlined_call_operand.vmem [shape: f32[25,128], index: 0, kind: input, shape index: {}]   ;;  %s1401_s1 = inlined_call_operand.vmem [shape: bf16[128,256], index: 1, kind: input, shape index: {}]   ;;  %s1402_s2 = inlined_call_operand.vmem [shape: f32[1,256], index: 2, kind: input, shape index: {}]   ;;  %s1403_s3 = inlined_call_operand.vmem [shape: bf16[256,256], index: 3, kind: input, shape index: {}]   ;;  %s1404_s4 = inlined_call_operand.vmem [shape: f32[1,256], index: 4, kind: input, shape index: {}]   ;;  %s1405_s5 = inlined_call_operand.vmem [shape: bf16[256,64], index: 5, kind: input, shape index: {}]   ;;  %s1406_s6 = inlined_call_operand.vmem [shape: f32[1,64], index: 6, kind: input, shape index: {}]   ;;  %s1407_s7 = inlined_call_operand.vmem [shape: f32[25,64], index: 7, kind: output, shape index: {}]  }
   0x1 LB: > { %s931_s25 = sadd.s32 4294967295, %s1132_s24   ;;  %p935_p0 = scmp.ge.s32.totalorder %s1132_s24, 1  ;;  %s1132_s24 = sphi %s1175_s24, %s17_s24  }
   0x2   : > { %p238_p1 = scmp.lt.s32.totalorder %s1132_s24, 3 }
   0x4   : > { %p239_p2 = pnand %p935_p0, %p238_p1 }
   0x5   : > { %v1038_v0 = vld [vmem:[%s1401_s1 + $0x4] ss:$8 sps:$4 sm:$0xff] (!%p239_p2)   ;;  %v1040_v1 = vld [vmem:[%s1401_s1] ss:$8 sps:$4 sm:$0xff] (!%p239_p2)   ;;  %v1134_v2 = vmov (!%p239_p2), 0   ;;  %s936_s17 = sshll.u32 (!%p239_p2), %s931_s25, 1  ;;  %v304_v63 = vlaneseq (!%p239_p2) }
   0x6   : > { %242 = sbr.rel (%p239_p2) target bundleno = 702 (0x2be), region = 48  ;;  %426 = vmatprep.mubr.bf16.mxu0 (!%p239_p2), %v1134_v2  ;;  %394 = vmatprep.subr.bf16.mxu0 (!%p239_p2), %v1038_v0  ;;  %v1041_v3 = vld [vmem:[%s1401_s1 + $0x14] ss:$8 sps:$4 sm:$0xff] (!%p239_p2)   ;;  %v1043_v4 = vld [vmem:[%s1401_s1 + $0x10] ss:$8 sps:$4 sm:$0xff] (!%p239_p2)   ;;  %p271_p3 = scmp.lt.s32.totalorder (!%p239_p2), %s936_s17, 3 }
   0x7   : > { %395 = vmatpush1.bf16.msra.mxu0 (!%p239_p2), %v1040_v1  ;;  %v1044_v5 = vld [vmem:[%s1401_s1 + $0x24] ss:$8 sps:$4 sm:$0xff] (!%p239_p2)   ;;  %v1046_v6 = vld [vmem:[%s1401_s1 + $0x20] ss:$8 sps:$4 sm:$0xff] (!%p239_p2)   ;;  %v1047_v7 = vld [vmem:[%s1401_s1 + $0x34] ss:$8 sps:$4 sm:$0xff] (!%p239_p2)  }
   0x8   : > { %396 = vmatprep.subr.bf16.mxu0 (!%p239_p2), %v1041_v3  ;;  %v1049_v8 = vld [vmem:[%s1401_s1 + $0x30] ss:$8 sps:$4 sm:$0xff] (!%p239_p2)   ;;  %v1050_v9 = vld [vmem:[%s1401_s1 + $0x44] ss:$8 sps:$4 sm:$0xff] (!%p239_p2)   ;;  %v1064_v11 = vld [vmem:[%s1403_s3] ss:$8 sps:$4 sm:$0xff] (!%p239_p2)  }
   0x9   : > { %v1062_v10 = vld [vmem:[%s1403_s3 + $0x4] ss:$8 sps:$4 sm:$0xff] (!%p239_p2)   ;;  %v1065_v12 = vld [vmem:[%s1403_s3 + $0x14] ss:$8 sps:$4 sm:$0xff] (!%p239_p2)   ;;  %v1052_v13 = vld [vmem:[%s1401_s1 + $0x40] ss:$8 sps:$4 sm:$0xff] (!%p239_p2)  }
   0xa   : > { %647 = vmatprep.subr.bf16.mxu1 (!%p239_p2), %v1062_v10  ;;  %v1067_v14 = vld [vmem:[%s1403_s3 + $0x10] ss:$8 sps:$4 sm:$0xff] (!%p239_p2)   ;;  %v1053_v15 = vld [vmem:[%s1401_s1 + $0x54] ss:$8 sps:$4 sm:$0xff] (!%p239_p2)   ;;  %v1068_v16 = vld [vmem:[%s1403_s3 + $0x24] ss:$8 sps:$4 sm:$0xff] (!%p239_p2)  }
   0xb   : > { %397 = vmatpush1.bf16.msra.mxu0 (!%p239_p2), %v1043_v4  ;;  %648 = vmatpush1.bf16.msra.mxu1 (!%p239_p2), %v1064_v11  ;;  %v1055_v17 = vld [vmem:[%s1401_s1 + $0x50] ss:$8 sps:$4 sm:$0xff] (!%p239_p2)   ;;  %v1070_v18 = vld [vmem:[%s1403_s3 + $0x20] ss:$8 sps:$4 sm:$0xff] (!%p239_p2)   ;;  %v1056_v19 = vld [vmem:[%s1401_s1 + $0x64] ss:$8 sps:$4 sm:$0xff] (!%p239_p2)  }
   0xc   : > { %398 = vmatprep.subr.bf16.mxu0 (!%p239_p2), %v1044_v5  ;;  %649 = vmatprep.subr.bf16.mxu1 (!%p239_p2), %v1065_v12  ;;  %v1071_v20 = vld [vmem:[%s1403_s3 + $0x34] ss:$8 sps:$4 sm:$0xff] (!%p239_p2)   ;;  %v1058_v21 = vld [vmem:[%s1401_s1 + $0x60] ss:$8 sps:$4 sm:$0xff] (!%p239_p2)   ;;  %v1073_v22 = vld [vmem:[%s1403_s3 + $0x30] ss:$8 sps:$4 sm:$0xff] (!%p239_p2)  }
   0xd   : > { %s1409_s17 = smov (!%p271_p3, %s936_s17), 3  ;;  %v1059_v23 = vld [vmem:[%s1401_s1 + $0x74] ss:$8 sps:$4 sm:$0xff]   ;;  %v1074_v24 = vld [vmem:[%s1403_s3 + $0x44] ss:$8 sps:$4 sm:$0xff]   ;;  %v305_v0 = vshrl.u32 %v304_v63, 7 }
   0xe   : > { %s937_s16 = sshll.u32 %s1409_s17, 3  ;;  %v1061_v25 = vld [vmem:[%s1401_s1 + $0x70] ss:$8 sps:$4 sm:$0xff]   ;;  %v1076_v28 = vld [vmem:[%s1403_s3 + $0x40] ss:$8 sps:$4 sm:$0xff]   ;;  %vm872_vm0 = vcmask 523264  }
   0xf   : > { %399 = vmatpush1.bf16.msra.mxu0 %v1046_v6  ;;  %650 = vmatpush1.bf16.msra.mxu1 %v1067_v14  ;;  %s274_s29 = scalar_lea.vmem %s1400_s0, %s937_s16  ;;  %v1077_v29 = vld [vmem:[%s1403_s3 + $0x54] ss:$8 sps:$4 sm:$0xff]   ;;  %v1079_v30 = vld [vmem:[%s1403_s3 + $0x50] ss:$8 sps:$4 sm:$0xff]   ;;  %v1080_v32 = vld [vmem:[%s1403_s3 + $0x64] ss:$8 sps:$4 sm:$0xff]   ;;  %s280_s23 = scalar_lea.vmem %s1407_s7, %s937_s16 }
  0x10   : > { %400 = vmatprep.subr.bf16.mxu0 %v1047_v7  ;;  %651 = vmatprep.subr.bf16.mxu1 %v1068_v16  ;;  %v283_v26 = vld [vmem:[%s274_s29] sm:$0xff]  ;;  %v284_v27 = vld [vmem:[%s274_s29 + $0x8] sm:$0xff]  ;;  %v1083_v34 = vld [vmem:[%s1403_s3 + $0x74] ss:$8 sps:$4 sm:$0xff]   ;;  %v306_v1 = vsub.s32 0, %v305_v0  ;;  %v310_v3 = vsub.s32 1, %v305_v0 }
  0x11   : > { %v285_v31 = vpack.c.bf16 %v284_v27, %v283_v26  ;;  %v1082_v33 = vld [vmem:[%s1403_s3 + $0x60] ss:$8 sps:$4 sm:$0xff]   ;;  %v1085_v35 = vld [vmem:[%s1403_s3 + $0x70] ss:$8 sps:$4 sm:$0xff]   ;;  %v1086_v36 = vld [vmem:[%s1403_s3 + $0x84] ss:$8 sps:$4 sm:$0xff]  }
  0x12   : > { %v1088_v37 = vld [vmem:[%s1403_s3 + $0x80] ss:$8 sps:$4 sm:$0xff]   ;;  %v1089_v38 = vld [vmem:[%s1403_s3 + $0x94] ss:$8 sps:$4 sm:$0xff]   ;;  %v1091_v39 = vld [vmem:[%s1403_s3 + $0x90] ss:$8 sps:$4 sm:$0xff]  }
  0x13   : > { %401 = vmatpush1.bf16.msra.mxu0 %v1049_v8  ;;  %652 = vmatpush1.bf16.msra.mxu1 %v1070_v18  ;;  %v1092_v40 = vld [vmem:[%s1403_s3 + $0xa4] ss:$8 sps:$4 sm:$0xff]   ;;  %v1094_v41 = vld [vmem:[%s1403_s3 + $0xa0] ss:$8 sps:$4 sm:$0xff]   ;;  %v1095_v42 = vld [vmem:[%s1403_s3 + $0xb4] ss:$8 sps:$4 sm:$0xff]  }
  0x14   : > { %402 = vmatprep.subr.bf16.mxu0 %v1050_v9  ;;  %653 = vmatprep.subr.bf16.mxu1 %v1071_v20  ;;  %v1097_v43 = vld [vmem:[%s1403_s3 + $0xb0] ss:$8 sps:$4 sm:$0xff]   ;;  %v1098_v44 = vld [vmem:[%s1403_s3 + $0xc4] ss:$8 sps:$4 sm:$0xff]   ;;  %v1100_v45 = vld [vmem:[%s1403_s3 + $0xc0] ss:$8 sps:$4 sm:$0xff]  }
  0x15   : > { %v1101_v46 = vld [vmem:[%s1403_s3 + $0xd4] ss:$8 sps:$4 sm:$0xff]   ;;  %v1103_v47 = vld [vmem:[%s1403_s3 + $0xd0] ss:$8 sps:$4 sm:$0xff]   ;;  %v1104_v48 = vld [vmem:[%s1403_s3 + $0xe4] ss:$8 sps:$4 sm:$0xff]  }
  0x16   : > { %v1106_v49 = vld [vmem:[%s1403_s3 + $0xe0] ss:$8 sps:$4 sm:$0xff]   ;;  %v1107_v50 = vld [vmem:[%s1403_s3 + $0xf4] ss:$8 sps:$4 sm:$0xff]   ;;  %v1109_v51 = vld [vmem:[%s1403_s3 + $0xf0] ss:$8 sps:$4 sm:$0xff]  }
  0x17   : > { %403 = vmatpush1.bf16.msra.mxu0 %v1052_v13  ;;  %654 = vmatpush1.bf16.msra.mxu1 %v1073_v22  ;;  %v1110_v52 = vld [vmem:[%s1405_s5 + $0x40] sm:$0xff]   ;;  %v1112_v54 = vld [vmem:[%s1405_s5 + $0x48] sm:$0xff]   ;;  %v1114_v56 = vld [vmem:[%s1405_s5 + $0x50] sm:$0xff]  }
  0x18   : > { %404 = vmatprep.subr.bf16.mxu0 %v1053_v15  ;;  %655 = vmatprep.subr.bf16.mxu1 %v1074_v24  ;;  %v1111_v53 = vld [vmem:[%s1405_s5] sm:$0xff]   ;;  %v1113_v55 = vld [vmem:[%s1405_s5 + $0x8] sm:$0xff]   ;;  %v1115_v57 = vld [vmem:[%s1405_s5 + $0x10] sm:$0xff]  }
  0x19   : > { %v1116_v58 = vld [vmem:[%s1405_s5 + $0x58] sm:$0xff]   ;;  %v1118_v60 = vld [vmem:[%s1405_s5 + $0x60] sm:$0xff]   ;;  %v1120_v62 = vld [vmem:[%s1405_s5 + $0x68] sm:$0xff]  }
  0x1a   : > { %v1117_v59 = vld [vmem:[%s1405_s5 + $0x18] sm:$0xff]   ;;  %v1119_v61 = vld [vmem:[%s1405_s5 + $0x20] sm:$0xff]   ;;  %v1121_v20 = vld [vmem:[%s1405_s5 + $0x28] sm:$0xff]  }
  0x1b   : > { %405 = vmatpush1.bf16.msra.mxu0 %v1055_v17  ;;  %656 = vmatpush1.bf16.msra.mxu1 %v1076_v28  ;;  %v302_v2 = vld [vmem:[%s1402_s2] sm:$0x3]  ;;  %v1123_v22 = vld [vmem:[%s1405_s5 + $0x30] sm:$0xff]   ;;  %v1125_v24 = vld [vmem:[%s1405_s5 + $0x38] sm:$0xff]  }
  0x1c   : > { %406 = vmatprep.subr.bf16.mxu0 %v1056_v19  ;;  %657 = vmatprep.subr.bf16.mxu1 %v1077_v29  ;;  %v307_v4 = vrot.slane %v302_v2, %v306_v1  ;;  %v311_v5 = vrot.slane %v302_v2, %v310_v3 }
  0x1f   : > { %407 = vmatpush1.bf16.msra.mxu0 %v1058_v21  ;;  %658 = vmatpush1.bf16.msra.mxu1 %v1079_v30  ;;  %v1122_v21 = vld [vmem:[%s1405_s5 + $0x70] sm:$0xff]  }
  0x20   : > { %408 = vmatprep.subr.bf16.mxu0 %v1059_v23  ;;  %659 = vmatprep.subr.bf16.mxu1 %v1080_v32  ;;  %v1124_v23 = vld [vmem:[%s1405_s5 + $0x78] sm:$0xff]  }
  0x23   : > { %409 = vmatpush1.bf16.msra.mxu0 %v1061_v25  ;;  %660 = vmatpush1.bf16.msra.mxu1 %v1082_v33  ;;  %v475_v25 = vld [vmem:[%s1404_s4] sm:$0x3] }
  0x24   : > { %661 = vmatprep.subr.bf16.mxu1 %v1083_v34  ;;  %1007 = vmatprep.subr.bf16.mxu0 %v1110_v52  ;;  %v480_v26 = vrot.slane %v475_v25, %v306_v1  ;;  %v484_v27 = vrot.slane %v475_v25, %v310_v3 }
  0x26   : > { %427 = vmatmul.mubr.bf16.vlgmr.msra.gmra.mrb[0].mxu0 %v285_v31 }
  0x27   : > { %662 = vmatpush1.bf16.msra.mxu1 %v1085_v35  ;;  %1008 = vmatpush3.bf16.msra.mxu0 %v1111_v53 }
  0x28   : > { %663 = vmatprep.subr.bf16.mxu1 %v1086_v36  ;;  %1009 = vmatprep.subr.bf16.mxu0 %v1112_v54 }
  0x2b   : > { %664 = vmatpush1.bf16.msra.mxu1 %v1088_v37  ;;  %1010 = vmatpush3.bf16.msra.mxu0 %v1113_v55 }
  0x2c   : > { %665 = vmatprep.subr.bf16.mxu1 %v1089_v38  ;;  %1011 = vmatprep.subr.bf16.mxu0 %v1114_v56 }
  0x2f   : > { %666 = vmatpush1.bf16.msra.mxu1 %v1091_v39  ;;  %1012 = vmatpush3.bf16.msra.mxu0 %v1115_v57 }
  0x30   : > { %667 = vmatprep.subr.bf16.mxu1 %v1092_v40  ;;  %1013 = vmatprep.subr.bf16.mxu0 %v1116_v58 }
  0x33   : > { %668 = vmatpush1.bf16.msra.mxu1 %v1094_v41  ;;  %1014 = vmatpush3.bf16.msra.mxu0 %v1117_v59 }
  0x34   : > { %669 = vmatprep.subr.bf16.mxu1 %v1095_v42  ;;  %1015 = vmatprep.subr.bf16.mxu0 %v1118_v60 }
  0x37   : > { %670 = vmatpush1.bf16.msra.mxu1 %v1097_v43  ;;  %1016 = vmatpush3.bf16.msra.mxu0 %v1119_v61  ;;  %v988_v43 = vld [vmem:[%s1406_s6] ss:$0 sm:$0xff] }
  0x38   : > { %671 = vmatprep.subr.bf16.mxu1 %v1098_v44  ;;  %1017 = vmatprep.subr.bf16.mxu0 %v1120_v62 }
  0x3b   : > { %672 = vmatpush1.bf16.msra.mxu1 %v1100_v45  ;;  %1018 = vmatpush3.bf16.msra.mxu0 %v1121_v20 }
  0x3c   : > { %673 = vmatprep.subr.bf16.mxu1 %v1101_v46  ;;  %1019 = vmatprep.subr.bf16.mxu0 %v1122_v21 }
  0x3f   : > { %674 = vmatpush1.bf16.msra.mxu1 %v1103_v47  ;;  %1020 = vmatpush3.bf16.msra.mxu0 %v1123_v22 }
  0x40   : > { %675 = vmatprep.subr.bf16.mxu1 %v1104_v48  ;;  %1021 = vmatprep.subr.bf16.mxu0 %v1124_v23 }
  0x43   : > { %676 = vmatpush1.bf16.msra.mxu1 %v1106_v49  ;;  %1022 = vmatpush3.bf16.msra.mxu0 %v1125_v24 }
  0x44   : > { %677 = vmatprep.subr.bf16.mxu1 %v1107_v50 }
  0x47   : > { %678 = vmatpush1.bf16.msra.mxu1 %v1109_v51 }
  0xf9   : > { %v428_v6 = vpop.f32.mrb[0].mxu0 }
  0xfa   : > { %v429_v7 = vadd.f32 %v428_v6, %v307_v4  ;;  %v430_v8 = vpop.f32.mrb[1].mxu0 }
  0xfb   : > { %v431_v9 = vadd.f32 %v430_v8, %v311_v5  ;;  %v432_v10 = vpop.f32.mrb[2].mxu0 }
  0xfc   : > { %v433_v11 = vadd.f32 %v432_v10, %v307_v4  ;;  %v434_v12 = vpop.f32.mrb[3].mxu0  ;;  %v437_v14 = vmax.f32 %v429_v7, 0.0 }
  0xfd   : > { %v435_v13 = vadd.f32 %v434_v12, %v311_v5  ;;  %v438_v16 = vmax.f32 %v431_v9, 0.0 }
  0xfe   : > { %v439_v15 = vmax.f32 %v433_v11, 0.0 }
  0xff   : > { %v440_v17 = vmax.f32 %v435_v13, 0.0 }
 0x100   : > { %v441_v18 = vpack.c.bf16 %v439_v15, %v437_v14 }
 0x101   : > { %v442_v19 = vpack.c.bf16 %v440_v17, %v438_v16 }
 0x103   : > { %679 = vmatprep.mubr.bf16.mxu1 %v442_v19 }
 0x104   : > { %680 = vmatmul.mubr.bf16.vlgmr.msra.gmra.mrb[0].mxu1 %v441_v18 }
 0x1d7   : > { %v681_v28 = vpop.f32.mrb[0].mxu1 }
 0x1d8   : > { %v682_v29 = vadd.f32 %v681_v28, %v480_v26  ;;  %v683_v30 = vpop.f32.mrb[1].mxu1 }
 0x1d9   : > { %v684_v31 = vadd.f32 %v683_v30, %v484_v27  ;;  %v685_v32 = vpop.f32.mrb[2].mxu1 }
 0x1da   : > { %v686_v33 = vadd.f32 %v685_v32, %v480_v26  ;;  %v687_v34 = vpop.f32.mrb[3].mxu1  ;;  %v690_v36 = vmax.f32 %v682_v29, 0.0 }
 0x1db   : > { %v688_v35 = vadd.f32 %v687_v34, %v484_v27  ;;  %v691_v38 = vmax.f32 %v684_v31, 0.0 }
 0x1dc   : > { %v692_v37 = vmax.f32 %v686_v33, 0.0 }
 0x1dd   : > { %v693_v39 = vmax.f32 %v688_v35, 0.0 }
 0x1de   : > { %v694_v40 = vpack.c.bf16 %v692_v37, %v690_v36 }
 0x1df   : > { %v695_v41 = vpack.c.bf16 %v693_v39, %v691_v38 }
 0x1e1   : > { %863 = vmatprep.mubr.bf16.mxu0 %v695_v41 }
 0x1e2   : > { %864 = vmatmul.mubr.bf16.vlgmr.msra.gmra.mrb[4].mxu0 %v694_v40 }
 0x2b5   : > { %v1023_v42 = vpop.f32.mrb[4].mxu0 }
 0x2b6   : > { %v1024_v44 = vpop.f32.mrb[5].mxu0 }
 0x2b7   : > { %v1025_v45 = vadd.f32 %v1024_v44, %v1023_v42  ;;  %v1026_v46 = vpop.f32.mrb[6].mxu0 }
 0x2b8   : > { %v1027_v47 = vpop.f32.mrb[7].mxu0 }
 0x2b9   : > { %v866_v48 = vadd.f32 %v1025_v45, %v988_v43  ;;  %v1028_v49 = vadd.f32 %v1027_v47, %v1026_v46 }
 0x2bb   : > { %873 = vst.msk [vmem:[%s280_s23] sm:$0xff] %vm872_vm0, %v866_v48  ;;  %v869_v50 = vadd.f32 %v1028_v49, %v988_v43 }
 0x2bd   : > { %874 = vst.msk [vmem:[%s280_s23 + $0x8] sm:$0xff] %vm872_vm0, %v869_v50 }
 0x2be PF: > { %s17_s24 = sadd.s32 1, %s1132_s24  }
 0x2bf   : > { %p14_p4 = scmp.ge.s32.totalorder %s17_s24, 4  }
 0x2c1   :  { %16 = sbr.rel (!%p14_p4) target bundleno = 1 (0x1), region = 78 }

</bundles_post_ra>
